<compile_context>
chip_gen: v5e
topology: v5e:2x2
jax: 0.10.0
libtpu: 0.0.40
codegen_flags: <defaults>
</compile_context>

<pallas_src>
import functools

import jax
import jax.numpy as jnp
from jax.experimental import pallas as pl
from jax.experimental.pallas import tpu as pltpu

TM, TN, TK = 256, 256, 256                      # max matmul tile sizes (MXU-friendly)
VMEM_LIMIT = 64 * 1024 * 1024                   # explicit scoped-VMEM cap (fits v7x physical)

_STAGES = ((3, 64, 1), (4, 128, 2), (6, 256, 2), (3, 512, 2))   # resnet50: blocks, width, stride
_EXPANSION = 4
_BN_EPS = 1e-5


def _round_up(x, m):
    return (x + m - 1) // m * m


# ----------------------------------------------------------------------------- Pallas kernels

def _matmul_kernel(x_ref, w_ref, s_ref, b_ref, *rest, relu, fuse_res):
    """out = act((x @ w) * scale + bias [+ residual]), accumulated over the K grid axis."""
    if fuse_res:
        r_ref, o_ref, acc_ref = rest
    else:
        o_ref, acc_ref = rest
    k = pl.program_id(2)

    @pl.when(k == 0)
    def _():
        acc_ref[...] = jnp.zeros_like(acc_ref)

    acc_ref[...] += jnp.dot(x_ref[...], w_ref[...], preferred_element_type=jnp.float32)

    @pl.when(k == pl.num_programs(2) - 1)
    def _():
        y = acc_ref[...] * s_ref[...] + b_ref[...]
        if fuse_res:
            y = y + r_ref[...].astype(jnp.float32)
        if relu:
            y = jnp.maximum(y, 0.0)
        o_ref[...] = y.astype(o_ref.dtype)


def _conv3x3_s1_kernel(x_ref, w_ref, s_ref, b_ref, o_ref, slab_ref, *,
                       H, W, Wrow, tmo, offsets, relu):
    """3x3 stride-1 conv + folded BN (+ReLU), halo padding fused into the kernel.

    At the first (m, j) step for an image, the unpadded NHWC block is copied row-by-row
    (row starts are multiples of Wrow, a multiple of 8 -> aligned stores) into a zero-filled
    VMEM slab laid out so that tap (kh, kw) of output row (ho*Wrow + wo) is simply slab row
    (kh+1)*Wrow + (kw-1) + ho*Wrow + wo.  Each grid step then accumulates 9 shifted
    (tmo, C) @ (C, tn) matmuls from the slab (no HBM round trip for the padded copy).
    """
    m = pl.program_id(1)
    j = pl.program_id(2)

    @pl.when((m == 0) & (j == 0))
    def _():
        slab_ref[...] = jnp.zeros_like(slab_ref)
        for h in range(H):
            slab_ref[(h + 2) * Wrow:(h + 2) * Wrow + W, :] = x_ref[0, h, :, :]

    base = pl.multiple_of(m * tmo, 8)
    acc = jnp.dot(slab_ref[pl.ds(base + offsets[0], tmo), :], w_ref[0],
                  preferred_element_type=jnp.float32)
    for t in range(1, len(offsets)):
        acc += jnp.dot(slab_ref[pl.ds(base + offsets[t], tmo), :], w_ref[t],
                       preferred_element_type=jnp.float32)
    y = acc * s_ref[...] + b_ref[...]
    if relu:
        y = jnp.maximum(y, 0.0)
    o_ref[0] = y.astype(o_ref.dtype)


def _conv_tap_kernel(x_ref, w_ref, s_ref, b_ref, o_ref, *, offsets, mo, relu):
    """kxk conv as sum over taps of shifted (mo, C) @ (C, tn) matmuls, fused BN (+ReLU)."""
    acc = jnp.dot(x_ref[0, offsets[0]:offsets[0] + mo, :], w_ref[0],
                  preferred_element_type=jnp.float32)
    for t in range(1, len(offsets)):
        off = offsets[t]
        acc += jnp.dot(x_ref[0, off:off + mo, :], w_ref[t],
                       preferred_element_type=jnp.float32)
    y = acc * s_ref[...] + b_ref[...]
    if relu:
        y = jnp.maximum(y, 0.0)
    o_ref[0] = y.astype(o_ref.dtype)


def _maxpool_tap_kernel(x_ref, o_ref, *, offsets, mo):
    m = x_ref[0, offsets[0]:offsets[0] + mo, :]
    for off in offsets[1:]:
        m = jnp.maximum(m, x_ref[0, off:off + mo, :])
    o_ref[0] = m


def _mean_hw_kernel(x_ref, o_ref):
    # (N, H*W, C) -> mean over the spatial axis (AdaptiveAvgPool2d((1,1)) + flatten).
    o_ref[...] = jnp.mean(x_ref[...].astype(jnp.float32), axis=1).astype(o_ref.dtype)


# ----------------------------------------------------------------------------- matmul wrapper

@functools.partial(jax.jit, static_argnames=("relu", "out_dtype"))
def matmul_bn_act(x, w, scale, bias, res=None, *, relu, out_dtype=jnp.bfloat16):
    """x:(M,K) @ w:(K,N) in bf16/f32-acc, per-column scale/bias, optional residual + ReLU."""
    M, K = x.shape
    _, Nc = w.shape
    fuse_res = res is not None

    tm = TM if M >= TM else max(16, _round_up(M, 16))       # bf16 packs (16,128) per vreg
    if K <= 128:
        tk = K                                              # full K dim, no pad copy
    elif M <= 256:
        tk = _round_up(K, 128)                              # single K step for tiny-M layers
    else:
        tk = min(_round_up(K, 128), TK)                     # (also pads stem K=147 -> 256)
    tn = Nc if Nc <= TN else TN

    Mp = _round_up(M, tm)
    # v7x megacore: ensure >=2 parallel output blocks when N can split lane-densely.
    if (Mp // tm) * pl.cdiv(Nc, tn) == 1 and Nc >= 256 and Nc % 256 == 0:
        tn = Nc // 2
    Kp, Np = _round_up(K, tk), _round_up(Nc, tn)

    xp = jnp.pad(x.astype(jnp.bfloat16), ((0, Mp - M), (0, Kp - K)))
    wp = jnp.pad(w.astype(jnp.bfloat16), ((0, Kp - K), (0, Np - Nc)))
    sp = jnp.pad(scale.astype(jnp.float32), (0, Np - Nc)).reshape(1, Np)
    bp = jnp.pad(bias.astype(jnp.float32), (0, Np - Nc)).reshape(1, Np)

    in_specs = [
        pl.BlockSpec((tm, tk), lambda i, j, k: (i, k)),
        pl.BlockSpec((tk, tn), lambda i, j, k: (k, j)),
        pl.BlockSpec((1, tn), lambda i, j, k: (0, j)),
        pl.BlockSpec((1, tn), lambda i, j, k: (0, j)),
    ]
    inputs = [xp, wp, sp, bp]
    if fuse_res:
        rp = jnp.pad(res.astype(jnp.bfloat16), ((0, Mp - M), (0, Np - Nc)))
        in_specs.append(pl.BlockSpec((tm, tn), lambda i, j, k: (i, j)))
        inputs.append(rp)

    out = pl.pallas_call(
        functools.partial(_matmul_kernel, relu=relu, fuse_res=fuse_res),
        out_shape=jax.ShapeDtypeStruct((Mp, Np), out_dtype),
        grid_spec=pltpu.PrefetchScalarGridSpec(
            num_scalar_prefetch=0,
            grid=(Mp // tm, Np // tn, Kp // tk),
            in_specs=in_specs,
            out_specs=pl.BlockSpec((tm, tn), lambda i, j, k: (i, j)),
            scratch_shapes=[pltpu.VMEM((tm, tn), jnp.float32)],
        ),
        compiler_params=pltpu.CompilerParams(
            dimension_semantics=("parallel", "parallel", "arbitrary"),
            vmem_limit_bytes=VMEM_LIMIT),
    )(*inputs)
    return out[:M, :Nc]


# ----------------------------------------------------------------------------- conv wrappers

@functools.partial(jax.jit, static_argnames=("relu",))
def conv3x3_s1_bn(x, w_taps, scale, bias, *, relu=True):
    """3x3 / stride-1 / pad-1 conv + folded BN (+ReLU); padding fused into the kernel."""
    N, H, W, C = x.shape
    Cout = w_taps.shape[-1]
    Wrow = _round_up(W + 2, 8)                   # padded row width (sublane aligned)
    th = max(1, min(H, 256 // Wrow))             # ~256 output rows per grid step
    h_tiles = pl.cdiv(H, th)
    tmo = th * Wrow
    R = (h_tiles * th + 4) * Wrow                # slab rows (incl. halo + slack, all zeroed)
    tn = Cout if Cout <= TN else TN
    # Tap (kh, kw) offset into the slab relative to output row ho*Wrow + wo.
    offsets = tuple((kh + 1) * Wrow + kw - 1 for kh in range(3) for kw in range(3))

    out = pl.pallas_call(
        functools.partial(_conv3x3_s1_kernel, H=H, W=W, Wrow=Wrow, tmo=tmo,
                          offsets=offsets, relu=relu),
        out_shape=jax.ShapeDtypeStruct((N, h_tiles * tmo, Cout), jnp.bfloat16),
        grid_spec=pltpu.PrefetchScalarGridSpec(
            num_scalar_prefetch=0,
            grid=(N, h_tiles, Cout // tn),
            in_specs=[
                pl.BlockSpec((1, H, W, C), lambda n, m, j: (n, 0, 0, 0)),
                pl.BlockSpec((9, C, tn), lambda n, m, j: (0, 0, j)),
                pl.BlockSpec((1, tn), lambda n, m, j: (0, j)),
                pl.BlockSpec((1, tn), lambda n, m, j: (0, j)),
            ],
            out_specs=pl.BlockSpec((1, tmo, tn), lambda n, m, j: (n, m, j)),
            scratch_shapes=[pltpu.VMEM((R, C), jnp.bfloat16)],
        ),
        compiler_params=pltpu.CompilerParams(
            # N is safe to shard across cores (the slab is rebuilt at (m==0, j==0) per image);
            # m / j must stay sequential per image so the slab is built before it is read.
            dimension_semantics=("parallel", "arbitrary", "arbitrary"),
            vmem_limit_bytes=VMEM_LIMIT),
    )(x.astype(jnp.bfloat16), w_taps.astype(jnp.bfloat16),
      scale.astype(jnp.float32).reshape(1, Cout),
      bias.astype(jnp.float32).reshape(1, Cout))
    return out.reshape(N, h_tiles * th, Wrow, Cout)[:, :H, :W, :]


def _phase_flatten(x, k, stride, pad, pad_value=0.0):
    """NHWC -> phase-stacked, spatially flattened (N, R, C) + static per-tap row offsets.

    Stride 2 is handled with a 4-phase space-to-depth split.  The per-phase row width Wph is
    padded to a multiple of 8 so kh-direction offsets and the phase stride stay sublane
    aligned.  Only used for the 3 stride-2 3x3 convs and the stem maxpool.
    """
    N, H, W, C = x.shape
    s = stride
    Ho = (H + 2 * pad - k) // s + 1
    Wo = (W + 2 * pad - k) // s + 1
    Hp = _round_up(H + 2 * pad, s)
    Wp = _round_up(W + 2 * pad, s)
    Hph, Wph0 = Hp // s, Wp // s
    Wph = _round_up(Wph0, 8)
    xp = jnp.pad(x, ((0, 0), (pad, Hp - H - pad), (pad, Wp - W - pad), (0, 0)),
                 constant_values=pad_value)
    phases = []
    for p in range(s):
        for q in range(s):
            ph = xp[:, p::s, q::s, :]                                     # (N, Hph, Wph0, C)
            phases.append(jnp.pad(ph, ((0, 0), (0, 1), (0, Wph - Wph0), (0, 0)),
                                  constant_values=pad_value))             # +1 slack row
    x2 = jnp.concatenate(phases, axis=1) if len(phases) > 1 else phases[0]
    x2 = x2.reshape(N, s * s * (Hph + 1) * Wph, C)

    offsets = []
    for kh in range(k):
        for kw in range(k):
            p, a = kh % s, kh // s
            q, b = kw % s, kw // s
            offsets.append(((p * s + q) * (Hph + 1) + a) * Wph + b)
    Mo = Ho * Wph
    assert max(offsets) + Mo <= x2.shape[1]
    return x2, tuple(offsets), Mo, Wph, Ho, Wo


@functools.partial(jax.jit, static_argnames=("k", "stride", "relu"))
def conv_kxk_bn(x, w_taps, scale, bias, *, k, stride, relu):
    """kxk stride-2 conv (pad=(k-1)//2) + folded BN (+ReLU) via the tap-offset kernel."""
    N, H, W, C = x.shape
    Cout = w_taps.shape[-1]
    x2, offsets, mo, wrow, Ho, Wo = _phase_flatten(
        x.astype(jnp.bfloat16), k, stride, (k - 1) // 2, pad_value=0.0)
    R = x2.shape[1]
    tn = Cout if Cout <= TN else TN

    out = pl.pallas_call(
        functools.partial(_conv_tap_kernel, offsets=offsets, mo=mo, relu=relu),
        out_shape=jax.ShapeDtypeStruct((N, mo, Cout), jnp.bfloat16),
        grid_spec=pltpu.PrefetchScalarGridSpec(
            num_scalar_prefetch=0,
            grid=(N, Cout // tn),
            in_specs=[
                pl.BlockSpec((1, R, C), lambda n, j: (n, 0, 0)),
                pl.BlockSpec((k * k, C, tn), lambda n, j: (0, 0, j)),
                pl.BlockSpec((1, tn), lambda n, j: (0, j)),
                pl.BlockSpec((1, tn), lambda n, j: (0, j)),
            ],
            out_specs=pl.BlockSpec((1, mo, tn), lambda n, j: (n, 0, j)),
        ),
        compiler_params=pltpu.CompilerParams(
            dimension_semantics=("parallel", "parallel"),
            vmem_limit_bytes=VMEM_LIMIT),
    )(x2, w_taps.astype(jnp.bfloat16),
      scale.astype(jnp.float32).reshape(1, Cout),
      bias.astype(jnp.float32).reshape(1, Cout))
    return out.reshape(N, Ho, wrow, Cout)[:, :, :Wo, :]


@functools.partial(jax.jit, static_argnames=("stride", "relu"))
def conv1x1_bn(x, w, scale, bias, res=None, *, stride=1, relu=True):
    """1x1 conv (+ folded BN, optional fused residual-add + ReLU) as a channel matmul."""
    N, H, W, C = x.shape
    # TODO(synk): fold the stride-2 subsample into the matmul index_map instead of a gather.
    xs = x[:, ::stride, ::stride, :] if stride > 1 else x
    Ho, Wo = xs.shape[1], xs.shape[2]
    cols = xs.reshape(N * Ho * Wo, C)
    res2 = None if res is None else res.reshape(N * Ho * Wo, -1)
    out = matmul_bn_act(cols, w, scale, bias, res2, relu=relu)
    return out.reshape(N, Ho, Wo, -1)


def _extract_patches(x, k, stride, pad, pad_value=0.0):
    N, H, W, C = x.shape
    xp = jnp.pad(x, ((0, 0), (pad, pad), (pad, pad), (0, 0)), constant_values=pad_value)
    Ho = (H + 2 * pad - k) // stride + 1
    Wo = (W + 2 * pad - k) // stride + 1
    cols = []
    for kh in range(k):
        for kw in range(k):
            cols.append(xp[:, kh:kh + stride * (Ho - 1) + 1:stride,
                           kw:kw + stride * (Wo - 1) + 1:stride, :])
    return jnp.stack(cols, axis=3), Ho, Wo


@functools.partial(jax.jit, static_argnames=("k", "stride", "pad", "relu"))
def conv_im2col_bn(x, w_taps, scale, bias, *, k, stride, pad, relu):
    """Only used for the 7x7/2 stem (C=3): im2col keeps the MXU K dimension sane there."""
    N, H, W, C = x.shape
    patches, Ho, Wo = _extract_patches(x.astype(jnp.bfloat16), k, stride, pad)
    cols = patches.reshape(N * Ho * Wo, k * k * C)
    w_mat = w_taps.reshape(k * k * C, -1)
    out = matmul_bn_act(cols, w_mat, scale, bias, relu=relu)
    return out.reshape(N, Ho, Wo, -1)


@jax.jit
def maxpool_3x3_s2(x):
    N, H, W, C = x.shape
    x2, offsets, mo, wrow, Ho, Wo = _phase_flatten(x, 3, 2, 1, pad_value=-jnp.inf)
    R = x2.shape[1]
    out = pl.pallas_call(
        functools.partial(_maxpool_tap_kernel, offsets=offsets, mo=mo),
        out_shape=jax.ShapeDtypeStruct((N, mo, C), x.dtype),
        grid_spec=pltpu.PrefetchScalarGridSpec(
            num_scalar_prefetch=0,
            grid=(N,),
            in_specs=[pl.BlockSpec((1, R, C), lambda n: (n, 0, 0))],
            out_specs=pl.BlockSpec((1, mo, C), lambda n: (n, 0, 0)),
        ),
        compiler_params=pltpu.CompilerParams(
            dimension_semantics=("parallel",),
            vmem_limit_bytes=VMEM_LIMIT),
    )(x2)
    return out.reshape(N, Ho, wrow, C)[:, :, :Wo, :]


@jax.jit
def global_avg_pool(x):
    N, H, W, C = x.shape
    return pl.pallas_call(
        _mean_hw_kernel,
        out_shape=jax.ShapeDtypeStruct((N, C), x.dtype),
    )(x.reshape(N, H * W, C))


# ----------------------------------------------------------------------------- parameters

class _KeyGen:
    def __init__(self, seed):
        self._key = jax.random.PRNGKey(seed)

    def __call__(self):
        self._key, k = jax.random.split(self._key)
        return k


def _conv_bn_params(kg, k, cin, cout):
    # Conv weight stored as (k*k, cin, cout): tap-major, matches both conv kernels.
    fan_in = k * k * cin
    w = jax.random.normal(kg(), (k * k, cin, cout), jnp.float32) * jnp.sqrt(2.0 / fan_in)
    gamma = 1.0 + 0.1 * jax.random.normal(kg(), (cout,), jnp.float32)
    beta = 0.1 * jax.random.normal(kg(), (cout,), jnp.float32)
    mean = 0.01 * jax.random.normal(kg(), (cout,), jnp.float32)
    var = jax.random.uniform(kg(), (cout,), jnp.float32, 0.5, 1.5)
    scale = gamma / jnp.sqrt(var + _BN_EPS)        # eval-mode BN folded into scale/bias
    bias = beta - mean * scale
    return {"w": w.astype(jnp.bfloat16), "scale": scale, "bias": bias}


def init_encoder_params(seed, embed_size):
    kg = _KeyGen(seed)
    params = {"stem": _conv_bn_params(kg, 7, 3, 64)}
    layers = []
    in_ch = 64
    for (blocks, width, _stride) in _STAGES:
        out_ch = width * _EXPANSION
        stage = []
        for b in range(blocks):
            blk = {
                "conv1": _conv_bn_params(kg, 1, in_ch, width),
                "conv2": _conv_bn_params(kg, 3, width, width),
                "conv3": _conv_bn_params(kg, 1, width, out_ch),
            }
            if b == 0:  # projection shortcut (channel change and/or stride)
                blk["downsample"] = _conv_bn_params(kg, 1, in_ch, out_ch)
            stage.append(blk)
            in_ch = out_ch
        layers.append(stage)
    params["layers"] = layers

    fc_in = 512 * _EXPANSION  # resnet.fc.in_features == 2048
    bound = 1.0 / float(fc_in) ** 0.5
    params["embed_w"] = jax.random.uniform(
        kg(), (fc_in, embed_size), jnp.float32, -bound, bound).astype(jnp.bfloat16)
    params["embed_b"] = jax.random.uniform(kg(), (embed_size,), jnp.float32, -bound, bound)
    return params


# ----------------------------------------------------------------------------- forward pass

def bottleneck(x, blk, stride):
    out = conv1x1_bn(x, blk["conv1"]["w"][0], blk["conv1"]["scale"], blk["conv1"]["bias"],
                     stride=1, relu=True)
    if stride == 1:
        out = conv3x3_s1_bn(out, blk["conv2"]["w"], blk["conv2"]["scale"],
                            blk["conv2"]["bias"], relu=True)
    else:
        out = conv_kxk_bn(out, blk["conv2"]["w"], blk["conv2"]["scale"], blk["conv2"]["bias"],
                          k=3, stride=stride, relu=True)
    if "downsample" in blk:
        identity = conv1x1_bn(x, blk["downsample"]["w"][0], blk["downsample"]["scale"],
                              blk["downsample"]["bias"], stride=stride, relu=False)
    else:
        identity = x
    # conv3 + bn3 with the residual add and final ReLU fused into the matmul epilogue.
    return conv1x1_bn(out, blk["conv3"]["w"][0], blk["conv3"]["scale"], blk["conv3"]["bias"],
                      res=identity, stride=1, relu=True)


def encoder_forward(params, images_nchw):
    """EncoderCNN.forward: NCHW images -> (N, embed_size) features."""
    # Cast to bf16 BEFORE the layout transpose (halves the transpose's HBM traffic).
    x = jnp.transpose(images_nchw.astype(jnp.bfloat16), (0, 2, 3, 1))
    s = params["stem"]
    x = conv_im2col_bn(x, s["w"], s["scale"], s["bias"], k=7, stride=2, pad=3, relu=True)
    x = maxpool_3x3_s2(x)
    for stage_idx, (blocks, _width, stride) in enumerate(_STAGES):     # layer1..layer4
        for b in range(blocks):
            x = bottleneck(x, params["layers"][stage_idx][b], stride if b == 0 else 1)
    feats = global_avg_pool(x)                                         # avgpool + view(N, -1)
    ones = jnp.ones((params["embed_w"].shape[1],), jnp.float32)
    return matmul_bn_act(feats, params["embed_w"], ones, params["embed_b"],
                         relu=False, out_dtype=jnp.float32)            # embed Linear


# ----------------------------------------------------------------------------- main

if __name__ == "__main__":
    embed_size = 128
    params = init_encoder_params(0, embed_size)

    key = jax.random.PRNGKey(0)
    # Smallest spatial size that survives resnet50's 5 stride-2 stages down to 1x1.
    images = jax.random.normal(key, (2, 3, 32, 32), jnp.float32)  # NCHW, like PyTorch

    feats = encoder_forward(params, images)
    feats = jax.block_until_ready(feats)

    assert feats.shape == (2, embed_size), feats.shape
    assert bool(jnp.all(jnp.isfinite(feats)))
    print("KERNEL_OK")
</pallas_src>

<mosaic_0001>
module attributes {stable_mosaic.version = 11 : i64} {
  func.func @_matmul_kernel(%arg0: i32, %arg1: i32, %arg2: i32, %arg3: memref<256x256xbf16, #tpu.memory_space<vmem>>, %arg4: memref<256x64xbf16, #tpu.memory_space<vmem>>, %arg5: memref<1x64xf32, #tpu.memory_space<vmem>>, %arg6: memref<1x64xf32, #tpu.memory_space<vmem>>, %arg7: memref<256x64xbf16, #tpu.memory_space<vmem>>, %arg8: memref<256x64xf32, #tpu.memory_space<vmem>>) attributes {dimension_semantics = [#tpu.dimension_semantics<parallel>, #tpu.dimension_semantics<parallel>, #tpu.dimension_semantics<arbitrary>], iteration_bounds = array<i64: 2, 1, 1>, scalar_prefetch = 0 : i64, scratch_operands = 1 : i64, tpu.core_type = #tpu.core_type<tc>, window_params = [{transform_indices = @transform_0, window_bounds = array<i64: 256, 256>}, {transform_indices = @transform_1, window_bounds = array<i64: 256, 64>}, {transform_indices = @transform_2, window_bounds = array<i64: 1, 64>}, {transform_indices = @transform_3, window_bounds = array<i64: 1, 64>}, {transform_indices = @transform_4, window_bounds = array<i64: 256, 64>}]} {
    %c0_i32 = arith.constant 0 : i32
    %0 = arith.cmpi eq, %arg2, %c0_i32 : i32
    %1 = arith.extui %0 : i1 to i32
    %c0_i32_0 = arith.constant 0 : i32
    %2 = arith.cmpi ne, %1, %c0_i32_0 : i32
    scf.if %2 {
      %cst_10 = arith.constant 0.000000e+00 : f32
      %12 = vector.broadcast %cst_10 : f32 to vector<256x64xf32>
      %c0_11 = arith.constant 0 : index
      %c0_12 = arith.constant 0 : index
      %13 = vector.load %arg8[%c0_11, %c0_12] : memref<256x64xf32, #tpu.memory_space<vmem>>, vector<256x64xf32>
      tpu.vector_store %arg8[%c0_11, %c0_12], %12 {strides = array<i32>} : memref<256x64xf32, #tpu.memory_space<vmem>>, vector<256x64xf32>,
    } else {
    }
    %c0 = arith.constant 0 : index
    %c0_1 = arith.constant 0 : index
    %3 = vector.load %arg8[%c0, %c0_1] : memref<256x64xf32, #tpu.memory_space<vmem>>, vector<256x64xf32>
    %c0_2 = arith.constant 0 : index
    %c0_3 = arith.constant 0 : index
    %4 = vector.load %arg3[%c0_2, %c0_3] : memref<256x256xbf16, #tpu.memory_space<vmem>>, vector<256x256xbf16>
    %c0_4 = arith.constant 0 : index
    %c0_5 = arith.constant 0 : index
    %5 = vector.load %arg4[%c0_4, %c0_5] : memref<256x64xbf16, #tpu.memory_space<vmem>>, vector<256x64xbf16>
    %cst = arith.constant dense<0.000000e+00> : vector<256x64xf32>
    %6 = tpu.matmul %4, %5, %cst {dimension_numbers = #tpu.dot_dimension_numbers<[1], [0], [0], [1], [0, 0, 1, 1], [], []>} : vector<256x256xbf16>, vector<256x64xbf16>, vector<256x64xf32> -> vector<256x64xf32>
    %7 = arith.addf %3, %6 : vector<256x64xf32>
    %c0_6 = arith.constant 0 : index
    %c0_7 = arith.constant 0 : index
    %8 = vector.load %arg8[%c0_6, %c0_7] : memref<256x64xf32, #tpu.memory_space<vmem>>, vector<256x64xf32>
    tpu.vector_store %arg8[%c0_6, %c0_7], %7 {strides = array<i32>} : memref<256x64xf32, #tpu.memory_space<vmem>>, vector<256x64xf32>,
    %c0_i32_8 = arith.constant 0 : i32
    %9 = arith.cmpi eq, %arg2, %c0_i32_8 : i32
    %10 = arith.extui %9 : i1 to i32
    %c0_i32_9 = arith.constant 0 : i32
    %11 = arith.cmpi ne, %10, %c0_i32_9 : i32
    scf.if %11 {
      %c0_10 = arith.constant 0 : index
      %c0_11 = arith.constant 0 : index
      %12 = vector.load %arg8[%c0_10, %c0_11] : memref<256x64xf32, #tpu.memory_space<vmem>>, vector<256x64xf32>
      %c0_12 = arith.constant 0 : index
      %c0_13 = arith.constant 0 : index
      %13 = vector.load %arg5[%c0_12, %c0_13] : memref<1x64xf32, #tpu.memory_space<vmem>>, vector<1x64xf32>
      %14 = vector.broadcast %13 : vector<1x64xf32> to vector<256x64xf32>
      %15 = arith.mulf %12, %14 : vector<256x64xf32>
      %c0_14 = arith.constant 0 : index
      %c0_15 = arith.constant 0 : index
      %16 = vector.load %arg6[%c0_14, %c0_15] : memref<1x64xf32, #tpu.memory_space<vmem>>, vector<1x64xf32>
      %17 = vector.broadcast %16 : vector<1x64xf32> to vector<256x64xf32>
      %18 = arith.addf %15, %17 : vector<256x64xf32>
      %cst_16 = arith.constant 0.000000e+00 : f32
      %19 = vector.broadcast %cst_16 : f32 to vector<256x64xf32>
      %20 = arith.maximumf %18, %19 : vector<256x64xf32>
      %21 = arith.truncf %20 : vector<256x64xf32> to vector<256x64xbf16>
      %c0_17 = arith.constant 0 : index
      %c0_18 = arith.constant 0 : index
      %22 = vector.load %arg7[%c0_17, %c0_18] : memref<256x64xbf16, #tpu.memory_space<vmem>>, vector<256x64xbf16>
      tpu.vector_store %arg7[%c0_17, %c0_18], %21 {strides = array<i32>} : memref<256x64xbf16, #tpu.memory_space<vmem>>, vector<256x64xbf16>,
    } else {
    }
    return
  }
  func.func @transform_0(%arg0: i32, %arg1: i32, %arg2: i32) -> (i32, i32) {
    %c0_i32 = arith.constant 0 : i32
    return %arg0, %arg2 : i32, i32
  }
  func.func @transform_1(%arg0: i32, %arg1: i32, %arg2: i32) -> (i32, i32) {
    %c0_i32 = arith.constant 0 : i32
    return %arg2, %arg1 : i32, i32
  }
  func.func @transform_2(%arg0: i32, %arg1: i32, %arg2: i32) -> (i32, i32) {
    %c0_i32 = arith.constant 0 : i32
    %c0_i32_0 = arith.constant 0 : i32
    return %c0_i32, %arg1 : i32, i32
  }
  func.func @transform_3(%arg0: i32, %arg1: i32, %arg2: i32) -> (i32, i32) {
    %c0_i32 = arith.constant 0 : i32
    %c0_i32_0 = arith.constant 0 : i32
    return %c0_i32, %arg1 : i32, i32
  }
  func.func @transform_4(%arg0: i32, %arg1: i32, %arg2: i32) -> (i32, i32) {
    %c0_i32 = arith.constant 0 : i32
    return %arg0, %arg1 : i32, i32
  }
}

</mosaic_0001>

<bundles_post_ra>
// kernel: matmul_bn_act.1
= control target key start
LH: loop header
LB: loop body
LE: loop exit
PB: predicated region body
PF: predicated region fallthrough
CT: control target
= control target key end

     0   :  { %s1619_s15 = smov 0   ;;  %s1621_s16 = smov 0   ;;  %s1977_s0 = inlined_call_operand.vmem [shape: bf16[512,256], index: 0, kind: input, shape index: {}]   ;;  %s1978_s1 = inlined_call_operand.vmem [shape: bf16[256,64], index: 1, kind: input, shape index: {}]   ;;  %s1979_s2 = inlined_call_operand.vmem [shape: f32[1,64], index: 2, kind: input, shape index: {}]   ;;  %s1980_s3 = inlined_call_operand.vmem [shape: f32[1,64], index: 3, kind: input, shape index: {}]   ;;  %s1981_s4 = inlined_call_operand.vmem [shape: bf16[512,64], index: 4, kind: output, shape index: {}]  }
   0x1   :  { %s1623_s17 = smov 0  }
   0x2 LB: > { %s33_s18 = sadd.s32 1, %s1587_s16  ;;  %p1277_p0 = scmp.ge.s32.totalorder %s1591_s17, 1  ;;  %s1591_s17 = sphi %s1623_s17, %s14_s17   ;;  %s1587_s16 = sphi %s1621_s16, %s1983_s16   ;;  %s1583_s15 = sphi %s1619_s15, %s1982_s15  }
   0x3   : > { %p35_p1 = scmp.ge.s32.totalorder %s33_s18, 2  ;;  %p224_p2 = scmp.lt.s32.totalorder %s1591_s17, 3 }
   0x5   : > { %s1985_s18 = smov (%p35_p1, %s33_s18), 0  ;;  %p225_p3 = pnand %p1277_p0, %p224_p2 }
   0x6   : > { %s1278_s5 = sshll.u32 (!%p225_p3), %s1583_s15, 5 }
   0x7   : > { %228 = sbr.rel (%p225_p3) target bundleno = 319 (0x13f), region = 36  ;;  %p274_p4 = scmp.lt.s32.totalorder (!%p225_p3), %s1278_s5, 63 }
   0xc   : > { %v1517_v0 = vld [vmem:[%s1978_s1 + $0x38] sm:$0xff]  ;;  %v1516_v2 = vld [vmem:[%s1978_s1 + $0x30] sm:$0xff]  ;;  %v1515_v4 = vld [vmem:[%s1978_s1 + $0x28] sm:$0xff]  ;;  %s1987_s5 = smov (!%p274_p4, %s1278_s5), 63  ;;  %vm312_vm0 = vcmask 523264   ;;  %vm1111_vm1 = vcmask 519168  }
   0xd   : > { %v1525_v1 = vld [vmem:[%s1978_s1 + $0x78] sm:$0xff]  ;;  %697 = vmatpush.bf16.msra.mxu0 %v1517_v0  ;;  %1526 = vmatpush.bf16.msra.mxu2 %v1517_v0  ;;  %v1524_v3 = vld [vmem:[%s1978_s1 + $0x70] sm:$0xff]  ;;  %v1523_v5 = vld [vmem:[%s1978_s1 + $0x68] sm:$0xff]  ;;  %s1477_s21 = sshll.u32 %s1987_s5, 3  ;;  %s1282_s12 = sshll.u32 %s1987_s5, 2 }
   0xe   : > { %786 = vmatpush.bf16.msra.mxu1 %v1525_v1  ;;  %1534 = vmatpush.bf16.msra.mxu3 %v1525_v1  ;;  %v1514_v6 = vld [vmem:[%s1978_s1 + $0x20] sm:$0xff]  ;;  %v1513_v8 = vld [vmem:[%s1978_s1 + $0x18] sm:$0xff]  ;;  %v1512_v10 = vld [vmem:[%s1978_s1 + $0x10] sm:$0xff]  ;;  %s1685_s26 = scalar_lea.vmem %s1977_s0, %s1477_s21  ;;  %s1811_s15 = scalar_lea.vmem %s1981_s4, %s1282_s12 }
   0xf   : > { %v1522_v7 = vld [vmem:[%s1978_s1 + $0x60] sm:$0xff]  ;;  %v1521_v9 = vld [vmem:[%s1978_s1 + $0x58] sm:$0xff]  ;;  %v1520_v11 = vld [vmem:[%s1978_s1 + $0x50] sm:$0xff] }
  0x10   : > { %v1511_v12 = vld [vmem:[%s1978_s1 + $0x8] sm:$0xff]  ;;  %v1510_v14 = vld [vmem:[%s1978_s1] sm:$0xff]  ;;  %v1293_v28 = vld [vmem:[%s1685_s26 + $0x10] sm:$0xf] }
  0x11   : > { %698 = vmatpush.bf16.msra.mxu0 %v1516_v2  ;;  %1527 = vmatpush.bf16.msra.mxu2 %v1516_v2  ;;  %v1519_v13 = vld [vmem:[%s1978_s1 + $0x48] sm:$0xff]  ;;  %v1518_v15 = vld [vmem:[%s1978_s1 + $0x40] sm:$0xff]  ;;  %v1481_v29 = vld [vmem:[%s1685_s26 + $0x14] sm:$0xf0] }
  0x12   : > { %787 = vmatpush.bf16.msra.mxu1 %v1524_v3  ;;  %1535 = vmatpush.bf16.msra.mxu3 %v1524_v3  ;;  %v1285_v16 = vld [vmem:[%s1685_s26] sm:$0xf]  ;;  %v1479_v17 = vld [vmem:[%s1685_s26 + $0x4] sm:$0xf0]  ;;  %v1478_v20 = vld [vmem:[%s1685_s26 + $0x4] sm:$0xf]  ;;  %v1294_v36 = vor.u32 %v1481_v29, %v1293_v28 }
  0x13   : > { %v1349_v18 = vld [vmem:[%s1685_s26 + $0x80] sm:$0xf]  ;;  %v1495_v19 = vld [vmem:[%s1685_s26 + $0x84] sm:$0xf0]  ;;  %v1287_v21 = vld [vmem:[%s1685_s26 + $0x8] sm:$0xf0]  ;;  %v1286_v24 = vor.u32 %v1479_v17, %v1285_v16 }
  0x14   : > { %v1494_v22 = vld [vmem:[%s1685_s26 + $0x84] sm:$0xf]  ;;  %v1351_v23 = vld [vmem:[%s1685_s26 + $0x88] sm:$0xf0]  ;;  %v1350_v25 = vor.u32 %v1495_v19, %v1349_v18  ;;  %v1290_v26 = vor.u32 %v1478_v20, %v1287_v21  ;;  %v1357_v30 = vld [vmem:[%s1685_s26 + $0x90] sm:$0xf] }
  0x15   : > { %699 = vmatpush.bf16.msra.mxu0 %v1515_v4  ;;  %1528 = vmatpush.bf16.msra.mxu2 %v1515_v4  ;;  %v1354_v27 = vor.u32 %v1494_v22, %v1351_v23  ;;  %v1497_v31 = vld [vmem:[%s1685_s26 + $0x94] sm:$0xf0]  ;;  %v1480_v32 = vld [vmem:[%s1685_s26 + $0x14] sm:$0xf]  ;;  %v1295_v33 = vld [vmem:[%s1685_s26 + $0x18] sm:$0xf0] }
  0x16   : > { %788 = vmatpush.bf16.msra.mxu1 %v1523_v5  ;;  %1536 = vmatpush.bf16.msra.mxu3 %v1523_v5  ;;  %v1496_v34 = vld [vmem:[%s1685_s26 + $0x94] sm:$0xf]  ;;  %v1359_v35 = vld [vmem:[%s1685_s26 + $0x98] sm:$0xf0]  ;;  %v1358_v37 = vor.u32 %v1497_v31, %v1357_v30  ;;  %v1298_v38 = vor.u32 %v1480_v32, %v1295_v33  ;;  %v1301_v40 = vld [vmem:[%s1685_s26 + $0x20] sm:$0xf] }
  0x17   : > { %v1362_v39 = vor.u32 %v1496_v34, %v1359_v35  ;;  %v1483_v41 = vld [vmem:[%s1685_s26 + $0x24] sm:$0xf0]  ;;  %v1365_v42 = vld [vmem:[%s1685_s26 + $0xa0] sm:$0xf]  ;;  %v1482_v44 = vld [vmem:[%s1685_s26 + $0x24] sm:$0xf] }
  0x18   : > { %v1499_v43 = vld [vmem:[%s1685_s26 + $0xa4] sm:$0xf0]  ;;  %v1303_v45 = vld [vmem:[%s1685_s26 + $0x28] sm:$0xf0]  ;;  %v1498_v46 = vld [vmem:[%s1685_s26 + $0xa4] sm:$0xf]  ;;  %v1302_v48 = vor.u32 %v1483_v41, %v1301_v40 }
  0x19   : > { %700 = vmatpush.bf16.msra.mxu0 %v1514_v6  ;;  %1529 = vmatpush.bf16.msra.mxu2 %v1514_v6  ;;  %v1367_v47 = vld [vmem:[%s1685_s26 + $0xa8] sm:$0xf0]  ;;  %v1366_v49 = vor.u32 %v1499_v43, %v1365_v42  ;;  %v1306_v50 = vor.u32 %v1482_v44, %v1303_v45  ;;  %v1309_v52 = vld [vmem:[%s1685_s26 + $0x30] sm:$0xf]  ;;  %v1485_v53 = vld [vmem:[%s1685_s26 + $0x34] sm:$0xf0] }
  0x1a   : > { %789 = vmatpush.bf16.msra.mxu1 %v1522_v7  ;;  %1537 = vmatpush.bf16.msra.mxu3 %v1522_v7  ;;  %v1370_v51 = vor.u32 %v1498_v46, %v1367_v47  ;;  %v1373_v54 = vld [vmem:[%s1685_s26 + $0xb0] sm:$0xf]  ;;  %v1501_v55 = vld [vmem:[%s1685_s26 + $0xb4] sm:$0xf0]  ;;  %v1484_v56 = vld [vmem:[%s1685_s26 + $0x34] sm:$0xf]  ;;  %v1310_v60 = vor.u32 %v1485_v53, %v1309_v52 }
  0x1b   : > { %v1311_v57 = vld [vmem:[%s1685_s26 + $0x38] sm:$0xf0]  ;;  %v1500_v58 = vld [vmem:[%s1685_s26 + $0xb4] sm:$0xf]  ;;  %v1374_v61 = vor.u32 %v1501_v55, %v1373_v54  ;;  %v1317_v0 = vld [vmem:[%s1685_s26 + $0x40] sm:$0xf] }
  0x1c   : > { %v1375_v59 = vld [vmem:[%s1685_s26 + $0xb8] sm:$0xf0]  ;;  %v1314_v62 = vor.u32 %v1484_v56, %v1311_v57  ;;  %v1487_v1 = vld [vmem:[%s1685_s26 + $0x44] sm:$0xf0]  ;;  %v1381_v2 = vld [vmem:[%s1685_s26 + $0xc0] sm:$0xf] }
  0x1d   : > { %701 = vmatpush.bf16.msra.mxu0 %v1513_v8  ;;  %1530 = vmatpush.bf16.msra.mxu2 %v1513_v8  ;;  %v1378_v63 = vor.u32 %v1500_v58, %v1375_v59  ;;  %v1503_v3 = vld [vmem:[%s1685_s26 + $0xc4] sm:$0xf0]  ;;  %v1486_v4 = vld [vmem:[%s1685_s26 + $0x44] sm:$0xf]  ;;  %v1319_v5 = vld [vmem:[%s1685_s26 + $0x48] sm:$0xf0]  ;;  %v1318_v8 = vor.u32 %v1487_v1, %v1317_v0 }
  0x1e   : > { %790 = vmatpush.bf16.msra.mxu1 %v1521_v9  ;;  %1538 = vmatpush.bf16.msra.mxu3 %v1521_v9  ;;  %v1502_v6 = vld [vmem:[%s1685_s26 + $0xc4] sm:$0xf]  ;;  %v1383_v7 = vld [vmem:[%s1685_s26 + $0xc8] sm:$0xf0]  ;;  %v1382_v9 = vor.u32 %v1503_v3, %v1381_v2  ;;  %v1488_v16 = vld [vmem:[%s1685_s26 + $0x54] sm:$0xf] }
  0x1f   : > { %v1327_v17 = vld [vmem:[%s1685_s26 + $0x58] sm:$0xf0]  ;;  %v1504_v18 = vld [vmem:[%s1685_s26 + $0xd4] sm:$0xf]  ;;  %v1490_v28 = vld [vmem:[%s1685_s26 + $0x64] sm:$0xf] }
  0x20   : > { %v1391_v19 = vld [vmem:[%s1685_s26 + $0xd8] sm:$0xf0]  ;;  %v1330_v22 = vor.u32 %v1488_v16, %v1327_v17  ;;  %v1335_v29 = vld [vmem:[%s1685_s26 + $0x68] sm:$0xf0]  ;;  %v1506_v30 = vld [vmem:[%s1685_s26 + $0xe4] sm:$0xf] }
  0x21   : > { %702 = vmatpush.bf16.msra.mxu0 %v1512_v10  ;;  %1531 = vmatpush.bf16.msra.mxu2 %v1512_v10  ;;  %v1322_v10 = vor.u32 %v1486_v4, %v1319_v5  ;;  %v1394_v23 = vor.u32 %v1504_v18, %v1391_v19  ;;  %v1399_v31 = vld [vmem:[%s1685_s26 + $0xe8] sm:$0xf0]  ;;  %v1338_v34 = vor.u32 %v1490_v28, %v1335_v29  ;;  %v1509_v40 = vld [vmem:[%s1685_s26 + $0xf4] sm:$0xf0]  ;;  %v1492_v41 = vld [vmem:[%s1685_s26 + $0x74] sm:$0xf] }
  0x22   : > { %791 = vmatpush.bf16.msra.mxu1 %v1520_v11  ;;  %1539 = vmatpush.bf16.msra.mxu3 %v1520_v11  ;;  %v1386_v11 = vor.u32 %v1502_v6, %v1383_v7  ;;  %v1402_v35 = vor.u32 %v1506_v30, %v1399_v31  ;;  %v1343_v42 = vld [vmem:[%s1685_s26 + $0x78] sm:$0xf0]  ;;  %v1508_v43 = vld [vmem:[%s1685_s26 + $0xf4] sm:$0xf]  ;;  %v1801_v0 = vld [vmem:[%s1980_s3] ss:$0 sm:$0xff] }
  0x23   : > { %v1407_v44 = vld [vmem:[%s1685_s26 + $0xf8] sm:$0xf0]  ;;  %v1346_v47 = vor.u32 %v1492_v41, %v1343_v42 }
  0x25   : > { %703 = vmatpush.bf16.msra.mxu0 %v1511_v12  ;;  %1532 = vmatpush.bf16.msra.mxu2 %v1511_v12  ;;  %v1325_v12 = vld [vmem:[%s1685_s26 + $0x50] sm:$0xf] }
  0x26   : > { %792 = vmatpush.bf16.msra.mxu1 %v1519_v13  ;;  %1540 = vmatpush.bf16.msra.mxu3 %v1519_v13  ;;  %v1489_v13 = vld [vmem:[%s1685_s26 + $0x54] sm:$0xf0] }
  0x27   : > { %v1326_v20 = vor.u32 %v1489_v13, %v1325_v12 }
  0x29   : > { %704 = vmatpush.bf16.msra.mxu0 %v1510_v14  ;;  %1533 = vmatpush.bf16.msra.mxu2 %v1510_v14  ;;  %v1389_v14 = vld [vmem:[%s1685_s26 + $0xd0] sm:$0xf] }
  0x2a   : > { %793 = vmatpush.bf16.msra.mxu1 %v1518_v15  ;;  %1541 = vmatpush.bf16.msra.mxu3 %v1518_v15  ;;  %v1505_v15 = vld [vmem:[%s1685_s26 + $0xd4] sm:$0xf0] }
  0x2b   : > { %v1390_v21 = vor.u32 %v1505_v15, %v1389_v14 }
  0x2c   : > { %705 = vmatmul.bf16.vlgmr.msra.gmra.mxu0 %v1286_v24  ;;  %745 = vmatmul.bf16.vlgmr.msra.gmra.mxu2 %v1350_v25  ;;  %v1333_v24 = vld [vmem:[%s1685_s26 + $0x60] sm:$0xf]  ;;  %v1491_v25 = vld [vmem:[%s1685_s26 + $0x64] sm:$0xf0] }
  0x2d   : > { %794 = vmatmul.bf16.vlgmr.msra.gmra.mxu1 %v1290_v26  ;;  %834 = vmatmul.bf16.vlgmr.msra.gmra.mxu3 %v1354_v27  ;;  %v1397_v26 = vld [vmem:[%s1685_s26 + $0xe0] sm:$0xf]  ;;  %v1507_v27 = vld [vmem:[%s1685_s26 + $0xe4] sm:$0xf0]  ;;  %v1334_v32 = vor.u32 %v1491_v25, %v1333_v24 }
  0x2e   : > { %v1398_v33 = vor.u32 %v1507_v27, %v1397_v26 }
  0x3c   : > { %710 = vmatmul.bf16.gmra.mxu0 %v1294_v36  ;;  %750 = vmatmul.bf16.gmra.mxu2 %v1358_v37  ;;  %v1593_v36 = vmov 0.0   ;;  %v1341_v37 = vld [vmem:[%s1685_s26 + $0x70] sm:$0xf] }
  0x3d   : > { %799 = vmatmul.bf16.gmra.mxu1 %v1298_v38  ;;  %839 = vmatmul.bf16.gmra.mxu3 %v1362_v39  ;;  %313 = vst.msk [vmem:[#allocation2] sm:$0xff] %vm312_vm0, %v1593_v36  ;;  %v1493_v38 = vld [vmem:[%s1685_s26 + $0x74] sm:$0xf0]  ;;  %v1405_v39 = vld [vmem:[%s1685_s26 + $0xf0] sm:$0xf] }
  0x3e   : > { %314 = vst.msk [vmem:[#allocation2 + $0x8] sm:$0xff] %vm312_vm0, %v1593_v36  ;;  %v1342_v45 = vor.u32 %v1493_v38, %v1341_v37  ;;  %v1406_v46 = vor.u32 %v1509_v40, %v1405_v39 }
  0x3f   : > { %315 = vst.msk [vmem:[#allocation2 + $0x10] sm:$0xff] %vm312_vm0, %v1593_v36 }
  0x40   : > { %316 = vst.msk [vmem:[#allocation2 + $0x18] sm:$0xff] %vm312_vm0, %v1593_v36 }
  0x41   : > { %317 = vst.msk [vmem:[#allocation2 + $0x20] sm:$0xff] %vm312_vm0, %v1593_v36 }
  0x42   : > { %318 = vst.msk [vmem:[#allocation2 + $0x28] sm:$0xff] %vm312_vm0, %v1593_v36 }
  0x43   : > { %319 = vst.msk [vmem:[#allocation2 + $0x30] sm:$0xff] %vm312_vm0, %v1593_v36 }
  0x44   : > { %320 = vst.msk [vmem:[#allocation2 + $0x38] sm:$0xff] %vm312_vm0, %v1593_v36 }
  0x45   : > { %321 = vst.msk [vmem:[#allocation2 + $0x40] sm:$0xff] %vm312_vm0, %v1593_v36  ;;  %v346_v59 = vld [vmem:[#allocation2 + $0x8] sm:$0xff] }
  0x46   : > { %322 = vst.msk [vmem:[#allocation2 + $0x48] sm:$0xff] %vm312_vm0, %v1593_v36 }
  0x47   : > { %323 = vst.msk [vmem:[#allocation2 + $0x50] sm:$0xff] %vm312_vm0, %v1593_v36  ;;  %v348_v29 = vld [vmem:[#allocation2 + $0x18] sm:$0xff] }
  0x48   : > { %324 = vst.msk [vmem:[#allocation2 + $0x58] sm:$0xff] %vm312_vm0, %v1593_v36 }
  0x49   : > { %325 = vst.msk [vmem:[#allocation2 + $0x60] sm:$0xff] %vm312_vm0, %v1593_v36 }
  0x4a   : > { %326 = vst.msk [vmem:[#allocation2 + $0x68] sm:$0xff] %vm312_vm0, %v1593_v36 }
  0x4b   : > { %327 = vst.msk [vmem:[#allocation2 + $0x70] sm:$0xff] %vm312_vm0, %v1593_v36 }
  0x4c   : > { %715 = vmatmul.bf16.gmra.mxu0 %v1302_v48  ;;  %755 = vmatmul.bf16.gmra.mxu2 %v1366_v49  ;;  %v1410_v48 = vor.u32 %v1508_v43, %v1407_v44  ;;  %328 = vst.msk [vmem:[#allocation2 + $0x78] sm:$0xff] %vm312_vm0, %v1593_v36 }
  0x4d   : > { %804 = vmatmul.bf16.gmra.mxu1 %v1306_v50  ;;  %844 = vmatmul.bf16.gmra.mxu3 %v1370_v51  ;;  %329 = vst.msk [vmem:[#allocation2 + $0x80] sm:$0xff] %vm312_vm0, %v1593_v36  ;;  %v345_v50 = vld [vmem:[#allocation2] sm:$0xff] }
  0x4e   : > { %330 = vst.msk [vmem:[#allocation2 + $0x88] sm:$0xff] %vm312_vm0, %v1593_v36 }
  0x4f   : > { %331 = vst.msk [vmem:[#allocation2 + $0x90] sm:$0xff] %vm312_vm0, %v1593_v36 }
  0x50   : > { %332 = vst.msk [vmem:[#allocation2 + $0x98] sm:$0xff] %vm312_vm0, %v1593_v36 }
  0x51   : > { %333 = vst.msk [vmem:[#allocation2 + $0xa0] sm:$0xff] %vm312_vm0, %v1593_v36 }
  0x52   : > { %334 = vst.msk [vmem:[#allocation2 + $0xa8] sm:$0xff] %vm312_vm0, %v1593_v36 }
  0x53   : > { %335 = vst.msk [vmem:[#allocation2 + $0xb0] sm:$0xff] %vm312_vm0, %v1593_v36 }
  0x54   : > { %336 = vst.msk [vmem:[#allocation2 + $0xb8] sm:$0xff] %vm312_vm0, %v1593_v36  ;;  %v361_v55 = vld [vmem:[#allocation2 + $0x80] sm:$0xff] }
  0x55   : > { %337 = vst.msk [vmem:[#allocation2 + $0xc0] sm:$0xff] %vm312_vm0, %v1593_v36  ;;  %v362_v5 = vld [vmem:[#allocation2 + $0x88] sm:$0xff] }
  0x56   : > { %338 = vst.msk [vmem:[#allocation2 + $0xc8] sm:$0xff] %vm312_vm0, %v1593_v36 }
  0x57   : > { %339 = vst.msk [vmem:[#allocation2 + $0xd0] sm:$0xff] %vm312_vm0, %v1593_v36  ;;  %v364_v43 = vld [vmem:[#allocation2 + $0x98] sm:$0xff] }
  0x58   : > { %340 = vst.msk [vmem:[#allocation2 + $0xd8] sm:$0xff] %vm312_vm0, %v1593_v36 }
  0x59   : > { %341 = vst.msk [vmem:[#allocation2 + $0xe0] sm:$0xff] %vm312_vm0, %v1593_v36 }
  0x5a   : > { %342 = vst.msk [vmem:[#allocation2 + $0xe8] sm:$0xff] %vm312_vm0, %v1593_v36 }
  0x5b   : > { %343 = vst.msk [vmem:[#allocation2 + $0xf0] sm:$0xff] %vm312_vm0, %v1593_v36 }
  0x5c   : > { %720 = vmatmul.bf16.gmra.mxu0 %v1310_v60  ;;  %760 = vmatmul.bf16.gmra.mxu2 %v1374_v61  ;;  %344 = vst.msk [vmem:[#allocation2 + $0xf8] sm:$0xff] %vm312_vm0, %v1593_v36  ;;  %v1796_v61 = vld [vmem:[%s1979_s2] ss:$0 sm:$0xff] }
  0x5d   : > { %809 = vmatmul.bf16.gmra.mxu1 %v1314_v62  ;;  %849 = vmatmul.bf16.gmra.mxu3 %v1378_v63 }
  0x6c   : > { %725 = vmatmul.bf16.gmra.mxu0 %v1318_v8  ;;  %765 = vmatmul.bf16.gmra.mxu2 %v1382_v9 }
  0x6d   : > { %814 = vmatmul.bf16.gmra.mxu1 %v1322_v10  ;;  %854 = vmatmul.bf16.gmra.mxu3 %v1386_v11  ;;  %v347_v10 = vld [vmem:[#allocation2 + $0x10] sm:$0xff] }
  0x7c   : > { %730 = vmatmul.bf16.gmra.mxu0 %v1326_v20  ;;  %770 = vmatmul.bf16.gmra.mxu2 %v1390_v21 }
  0x7d   : > { %819 = vmatmul.bf16.gmra.mxu1 %v1330_v22  ;;  %859 = vmatmul.bf16.gmra.mxu3 %v1394_v23  ;;  %v363_v23 = vld [vmem:[#allocation2 + $0x90] sm:$0xff] }
  0x8c   : > { %735 = vmatmul.bf16.gmra.mxu0 %v1334_v32  ;;  %775 = vmatmul.bf16.gmra.mxu2 %v1398_v33 }
  0x8d   : > { %824 = vmatmul.bf16.gmra.mxu1 %v1338_v34  ;;  %864 = vmatmul.bf16.gmra.mxu3 %v1402_v35 }
  0x9c   : > { %740 = vmatmul.bf16.gmra.mxu0 %v1342_v45  ;;  %780 = vmatmul.bf16.gmra.mxu2 %v1406_v46 }
  0x9d   : > { %829 = vmatmul.bf16.gmra.mxu1 %v1346_v47  ;;  %869 = vmatmul.bf16.gmra.mxu3 %v1410_v48 }
  0xa9   : > { %v706_v49 = vpop.f32.mrf.mxu0 }
  0xaa   : > { %v795_v51 = vpop.f32.mrf.mxu1 }
  0xab   : > { %v796_v52 = vadd.f32 %v795_v51, %v706_v49  ;;  %v349_v49 = vld [vmem:[#allocation2 + $0x20] sm:$0xff] }
  0xad   : > { %v875_v53 = vadd.f32 %v796_v52, %v345_v50 }
  0xaf   : > { %908 = vst.msk [vmem:[#allocation2] sm:$0xff] %vm312_vm0, %v875_v53  ;;  %v746_v54 = vpop.f32.mrf.mxu2 }
  0xb0   : > { %v835_v56 = vpop.f32.mrf.mxu3 }
  0xb1   : > { %v836_v57 = vadd.f32 %v835_v56, %v746_v54  ;;  %v708_v58 = vpop.f32.mrf.mxu0 }
  0xb2   : > { %v797_v60 = vpop.f32.mrf.mxu1 }
  0xb3   : > { %v891_v62 = vadd.f32 %v836_v57, %v361_v55  ;;  %v798_v63 = vadd.f32 %v797_v60, %v708_v58 }
  0xb5   : > { %924 = vst.msk [vmem:[#allocation2 + $0x80] sm:$0xff] %vm312_vm0, %v891_v62  ;;  %v876_v1 = vadd.f32 %v798_v63, %v346_v59 }
  0xb6   : > { %v943_v2 = vld [vmem:[#allocation2] sm:$0xff] }
  0xb7   : > { %v979_v3 = vmul.f32 %v1796_v61, %v943_v2  ;;  %909 = vst.msk [vmem:[#allocation2 + $0x8] sm:$0xff] %vm312_vm0, %v876_v1  ;;  %v748_v4 = vpop.f32.mrf.mxu2  ;;  %v365_v1 = vld [vmem:[#allocation2 + $0xa0] sm:$0xff] }
  0xb8   : > { %v837_v6 = vpop.f32.mrf.mxu3 }
  0xb9   : > { %v1015_v7 = vadd.f32 %v1801_v0, %v979_v3  ;;  %v838_v8 = vadd.f32 %v837_v6, %v748_v4  ;;  %v711_v9 = vpop.f32.mrf.mxu0 }
  0xba   : > { %v800_v11 = vpop.f32.mrf.mxu1 }
  0xbb   : > { %v1047_v12 = vmax.f32 %v1015_v7, 0.0  ;;  %v892_v13 = vadd.f32 %v838_v8, %v362_v5  ;;  %v801_v14 = vadd.f32 %v800_v11, %v711_v9  ;;  %v350_v7 = vld [vmem:[#allocation2 + $0x28] sm:$0xff] }
  0xbc   : > { %v959_v15 = vld [vmem:[#allocation2 + $0x80] sm:$0xff] }
  0xbd   : > { %v1079_v16 = vpack.c.bf16 %v1047_v12, %v1047_v12  ;;  %v995_v17 = vmul.f32 %v1796_v61, %v959_v15  ;;  %925 = vst.msk [vmem:[#allocation2 + $0x88] sm:$0xff] %vm312_vm0, %v892_v13  ;;  %v877_v18 = vadd.f32 %v801_v14, %v347_v10 }
  0xbe   : > { %v944_v19 = vld [vmem:[#allocation2 + $0x8] sm:$0xff] }
  0xbf   : > { %1112 = vst.msk [vmem:[%s1811_s15] sm:$0xf] %vm1111_vm1, %v1079_v16  ;;  %v1031_v20 = vadd.f32 %v1801_v0, %v995_v17  ;;  %v980_v21 = vmul.f32 %v1796_v61, %v944_v19  ;;  %v751_v22 = vpop.f32.mrf.mxu2 }
  0xc0   : > { %910 = vst.msk [vmem:[#allocation2 + $0x10] sm:$0xff] %vm312_vm0, %v877_v18  ;;  %v840_v24 = vpop.f32.mrf.mxu3 }
  0xc1   : > { %v1063_v25 = vmax.f32 %v1031_v20, 0.0  ;;  %v1016_v26 = vadd.f32 %v1801_v0, %v980_v21  ;;  %v841_v27 = vadd.f32 %v840_v24, %v751_v22  ;;  %v713_v28 = vpop.f32.mrf.mxu0  ;;  %v366_v21 = vld [vmem:[#allocation2 + $0xa8] sm:$0xff] }
  0xc2   : > { %v802_v30 = vpop.f32.mrf.mxu1 }
  0xc3   : > { %v1095_v31 = vpack.c.bf16 %v1063_v25, %v1063_v25  ;;  %v1048_v32 = vmax.f32 %v1016_v26, 0.0  ;;  %v893_v33 = vadd.f32 %v841_v27, %v363_v23  ;;  %v803_v34 = vadd.f32 %v802_v30, %v713_v28  ;;  %v351_v27 = vld [vmem:[#allocation2 + $0x30] sm:$0xff] }
  0xc4   : > { %v960_v35 = vld [vmem:[#allocation2 + $0x88] sm:$0xff] }
  0xc5   : > { %1128 = vst.msk [vmem:[%s1811_s15 + $0x40] sm:$0xf] %vm1111_vm1, %v1095_v31  ;;  %v1080_v36 = vpack.c.bf16 %v1048_v32, %v1048_v32  ;;  %v996_v37 = vmul.f32 %v1796_v61, %v960_v35  ;;  %v878_v38 = vadd.f32 %v803_v34, %v348_v29 }
  0xc6   : > { %926 = vst.msk [vmem:[#allocation2 + $0x90] sm:$0xff] %vm312_vm0, %v893_v33 }
  0xc7   : > { %1113 = vst.msk [vmem:[%s1811_s15 + $0x4] sm:$0xf] %vm1111_vm1, %v1080_v36  ;;  %v1032_v39 = vadd.f32 %v1801_v0, %v996_v37  ;;  %v945_v40 = vld [vmem:[#allocation2 + $0x10] sm:$0xff]  ;;  %v753_v41 = vpop.f32.mrf.mxu2 }
  0xc8   : > { %v981_v42 = vmul.f32 %v1796_v61, %v945_v40  ;;  %911 = vst.msk [vmem:[#allocation2 + $0x18] sm:$0xff] %vm312_vm0, %v878_v38  ;;  %v842_v44 = vpop.f32.mrf.mxu3 }
  0xc9   : > { %v1064_v45 = vmax.f32 %v1032_v39, 0.0  ;;  %v843_v46 = vadd.f32 %v842_v44, %v753_v41  ;;  %v716_v47 = vpop.f32.mrf.mxu0  ;;  %v367_v41 = vld [vmem:[#allocation2 + $0xb0] sm:$0xff] }
  0xca   : > { %v1017_v48 = vadd.f32 %v1801_v0, %v981_v42  ;;  %v805_v50 = vpop.f32.mrf.mxu1 }
  0xcb   : > { %v1096_v51 = vpack.c.bf16 %v1064_v45, %v1064_v45  ;;  %v894_v52 = vadd.f32 %v843_v46, %v364_v43  ;;  %v806_v53 = vadd.f32 %v805_v50, %v716_v47  ;;  %v352_v47 = vld [vmem:[#allocation2 + $0x38] sm:$0xff] }
  0xcc   : > { %v1049_v54 = vmax.f32 %v1017_v48, 0.0 }
  0xcd   : > { %1129 = vst.msk [vmem:[%s1811_s15 + $0x44] sm:$0xf] %vm1111_vm1, %v1096_v51  ;;  %v961_v55 = vld [vmem:[#allocation2 + $0x90] sm:$0xff]  ;;  %v879_v56 = vadd.f32 %v806_v53, %v349_v49 }
  0xce   : > { %v1081_v57 = vpack.c.bf16 %v1049_v54, %v1049_v54  ;;  %v997_v58 = vmul.f32 %v1796_v61, %v961_v55  ;;  %927 = vst.msk [vmem:[#allocation2 + $0x98] sm:$0xff] %vm312_vm0, %v894_v52 }
  0xcf   : > { %v946_v59 = vld [vmem:[#allocation2 + $0x18] sm:$0xff]  ;;  %912 = vst.msk [vmem:[#allocation2 + $0x20] sm:$0xff] %vm312_vm0, %v879_v56  ;;  %v756_v60 = vpop.f32.mrf.mxu2 }
  0xd0   : > { %1114 = vst.msk [vmem:[%s1811_s15 + $0x8] sm:$0xf] %vm1111_vm1, %v1081_v57  ;;  %v1033_v62 = vadd.f32 %v1801_v0, %v997_v58  ;;  %v982_v63 = vmul.f32 %v1796_v61, %v946_v59  ;;  %v845_v2 = vpop.f32.mrf.mxu3 }
  0xd1   : > { %v846_v3 = vadd.f32 %v845_v2, %v756_v60  ;;  %v718_v4 = vpop.f32.mrf.mxu0 }
  0xd2   : > { %v1065_v5 = vmax.f32 %v1033_v62, 0.0  ;;  %v1018_v6 = vadd.f32 %v1801_v0, %v982_v63  ;;  %v807_v8 = vpop.f32.mrf.mxu1  ;;  %v368_v62 = vld [vmem:[#allocation2 + $0xb8] sm:$0xff] }
  0xd3   : > { %v895_v9 = vadd.f32 %v846_v3, %v365_v1  ;;  %v808_v10 = vadd.f32 %v807_v8, %v718_v4 }
  0xd4   : > { %v1097_v11 = vpack.c.bf16 %v1065_v5, %v1065_v5  ;;  %v1050_v12 = vmax.f32 %v1018_v6, 0.0  ;;  %v353_v5 = vld [vmem:[#allocation2 + $0x40] sm:$0xff] }
  0xd5   : > { %v962_v13 = vld [vmem:[#allocation2 + $0x98] sm:$0xff]  ;;  %928 = vst.msk [vmem:[#allocation2 + $0xa0] sm:$0xff] %vm312_vm0, %v895_v9  ;;  %v880_v14 = vadd.f32 %v808_v10, %v350_v7 }
  0xd6   : > { %1130 = vst.msk [vmem:[%s1811_s15 + $0x48] sm:$0xf] %vm1111_vm1, %v1097_v11  ;;  %v1082_v15 = vpack.c.bf16 %v1050_v12, %v1050_v12  ;;  %v998_v16 = vmul.f32 %v1796_v61, %v962_v13  ;;  %v947_v17 = vld [vmem:[#allocation2 + $0x20] sm:$0xff] }
  0xd7   : > { %v983_v18 = vmul.f32 %v1796_v61, %v947_v17  ;;  %913 = vst.msk [vmem:[#allocation2 + $0x28] sm:$0xff] %vm312_vm0, %v880_v14  ;;  %v758_v19 = vpop.f32.mrf.mxu2 }
  0xd8   : > { %1115 = vst.msk [vmem:[%s1811_s15 + $0xc] sm:$0xf] %vm1111_vm1, %v1082_v15  ;;  %v1034_v20 = vadd.f32 %v1801_v0, %v998_v16  ;;  %v847_v22 = vpop.f32.mrf.mxu3 }
  0xd9   : > { %v1019_v23 = vadd.f32 %v1801_v0, %v983_v18  ;;  %v848_v24 = vadd.f32 %v847_v22, %v758_v19  ;;  %v721_v25 = vpop.f32.mrf.mxu0  ;;  %v369_v19 = vld [vmem:[#allocation2 + $0xc0] sm:$0xff] }
  0xda   : > { %v1066_v26 = vmax.f32 %v1034_v20, 0.0  ;;  %v810_v28 = vpop.f32.mrf.mxu1 }
  0xdb   : > { %v1051_v29 = vmax.f32 %v1019_v23, 0.0  ;;  %v896_v30 = vadd.f32 %v848_v24, %v366_v21  ;;  %v811_v31 = vadd.f32 %v810_v28, %v721_v25  ;;  %v354_v25 = vld [vmem:[#allocation2 + $0x48] sm:$0xff] }
  0xdc   : > { %v1098_v32 = vpack.c.bf16 %v1066_v26, %v1066_v26  ;;  %v963_v33 = vld [vmem:[#allocation2 + $0xa0] sm:$0xff] }
  0xdd   : > { %v1083_v34 = vpack.c.bf16 %v1051_v29, %v1051_v29  ;;  %v999_v35 = vmul.f32 %v1796_v61, %v963_v33  ;;  %929 = vst.msk [vmem:[#allocation2 + $0xa8] sm:$0xff] %vm312_vm0, %v896_v30  ;;  %v881_v36 = vadd.f32 %v811_v31, %v351_v27 }
  0xde   : > { %1131 = vst.msk [vmem:[%s1811_s15 + $0x4c] sm:$0xf] %vm1111_vm1, %v1098_v32  ;;  %v948_v37 = vld [vmem:[#allocation2 + $0x28] sm:$0xff] }
  0xdf   : > { %1116 = vst.msk [vmem:[%s1811_s15 + $0x10] sm:$0xf] %vm1111_vm1, %v1083_v34  ;;  %v1035_v38 = vadd.f32 %v1801_v0, %v999_v35  ;;  %v984_v39 = vmul.f32 %v1796_v61, %v948_v37  ;;  %v761_v40 = vpop.f32.mrf.mxu2 }
  0xe0   : > { %914 = vst.msk [vmem:[#allocation2 + $0x30] sm:$0xff] %vm312_vm0, %v881_v36  ;;  %v850_v42 = vpop.f32.mrf.mxu3 }
  0xe1   : > { %v1067_v43 = vmax.f32 %v1035_v38, 0.0  ;;  %v1020_v44 = vadd.f32 %v1801_v0, %v984_v39  ;;  %v851_v45 = vadd.f32 %v850_v42, %v761_v40  ;;  %v723_v46 = vpop.f32.mrf.mxu0  ;;  %v370_v39 = vld [vmem:[#allocation2 + $0xc8] sm:$0xff] }
  0xe2   : > { %v812_v48 = vpop.f32.mrf.mxu1 }
  0xe3   : > { %v1099_v49 = vpack.c.bf16 %v1067_v43, %v1067_v43  ;;  %v1052_v50 = vmax.f32 %v1020_v44, 0.0  ;;  %v897_v51 = vadd.f32 %v851_v45, %v367_v41  ;;  %v813_v52 = vadd.f32 %v812_v48, %v723_v46  ;;  %v355_v45 = vld [vmem:[#allocation2 + $0x50] sm:$0xff] }
  0xe4   : > { %v964_v53 = vld [vmem:[#allocation2 + $0xa8] sm:$0xff] }
  0xe5   : > { %1132 = vst.msk [vmem:[%s1811_s15 + $0x50] sm:$0xf] %vm1111_vm1, %v1099_v49  ;;  %v1084_v54 = vpack.c.bf16 %v1052_v50, %v1052_v50  ;;  %v1000_v55 = vmul.f32 %v1796_v61, %v964_v53  ;;  %v882_v56 = vadd.f32 %v813_v52, %v352_v47 }
  0xe6   : > { %930 = vst.msk [vmem:[#allocation2 + $0xb0] sm:$0xff] %vm312_vm0, %v897_v51 }
  0xe7   : > { %1117 = vst.msk [vmem:[%s1811_s15 + $0x14] sm:$0xf] %vm1111_vm1, %v1084_v54  ;;  %v1036_v57 = vadd.f32 %v1801_v0, %v1000_v55  ;;  %v949_v58 = vld [vmem:[#allocation2 + $0x30] sm:$0xff]  ;;  %v763_v59 = vpop.f32.mrf.mxu2 }
  0xe8   : > { %v985_v60 = vmul.f32 %v1796_v61, %v949_v58  ;;  %915 = vst.msk [vmem:[#allocation2 + $0x38] sm:$0xff] %vm312_vm0, %v882_v56  ;;  %v852_v63 = vpop.f32.mrf.mxu3 }
  0xe9   : > { %v1068_v1 = vmax.f32 %v1036_v57, 0.0  ;;  %v853_v2 = vadd.f32 %v852_v63, %v763_v59  ;;  %v726_v3 = vpop.f32.mrf.mxu0  ;;  %v371_v59 = vld [vmem:[#allocation2 + $0xd0] sm:$0xff] }
  0xea   : > { %v1021_v4 = vadd.f32 %v1801_v0, %v985_v60  ;;  %v815_v6 = vpop.f32.mrf.mxu1 }
  0xeb   : > { %v1100_v7 = vpack.c.bf16 %v1068_v1, %v1068_v1  ;;  %v898_v8 = vadd.f32 %v853_v2, %v368_v62  ;;  %v816_v9 = vadd.f32 %v815_v6, %v726_v3  ;;  %v356_v3 = vld [vmem:[#allocation2 + $0x58] sm:$0xff] }
  0xec   : > { %v1053_v10 = vmax.f32 %v1021_v4, 0.0 }
  0xed   : > { %1133 = vst.msk [vmem:[%s1811_s15 + $0x54] sm:$0xf] %vm1111_vm1, %v1100_v7  ;;  %v965_v11 = vld [vmem:[#allocation2 + $0xb0] sm:$0xff]  ;;  %v883_v12 = vadd.f32 %v816_v9, %v353_v5 }
  0xee   : > { %v1085_v13 = vpack.c.bf16 %v1053_v10, %v1053_v10  ;;  %v1001_v14 = vmul.f32 %v1796_v61, %v965_v11  ;;  %931 = vst.msk [vmem:[#allocation2 + $0xb8] sm:$0xff] %vm312_vm0, %v898_v8 }
  0xef   : > { %v950_v15 = vld [vmem:[#allocation2 + $0x38] sm:$0xff]  ;;  %916 = vst.msk [vmem:[#allocation2 + $0x40] sm:$0xff] %vm312_vm0, %v883_v12  ;;  %v766_v16 = vpop.f32.mrf.mxu2 }
  0xf0   : > { %1118 = vst.msk [vmem:[%s1811_s15 + $0x18] sm:$0xf] %vm1111_vm1, %v1085_v13  ;;  %v1037_v17 = vadd.f32 %v1801_v0, %v1001_v14  ;;  %v986_v18 = vmul.f32 %v1796_v61, %v950_v15  ;;  %v855_v20 = vpop.f32.mrf.mxu3 }
  0xf1   : > { %v856_v21 = vadd.f32 %v855_v20, %v766_v16  ;;  %v728_v22 = vpop.f32.mrf.mxu0 }
  0xf2   : > { %v1069_v23 = vmax.f32 %v1037_v17, 0.0  ;;  %v1022_v24 = vadd.f32 %v1801_v0, %v986_v18  ;;  %v817_v26 = vpop.f32.mrf.mxu1  ;;  %v372_v17 = vld [vmem:[#allocation2 + $0xd8] sm:$0xff] }
  0xf3   : > { %v899_v27 = vadd.f32 %v856_v21, %v369_v19  ;;  %v818_v28 = vadd.f32 %v817_v26, %v728_v22 }
  0xf4   : > { %v1101_v29 = vpack.c.bf16 %v1069_v23, %v1069_v23  ;;  %v1054_v30 = vmax.f32 %v1022_v24, 0.0  ;;  %v357_v23 = vld [vmem:[#allocation2 + $0x60] sm:$0xff] }
  0xf5   : > { %v966_v31 = vld [vmem:[#allocation2 + $0xb8] sm:$0xff]  ;;  %932 = vst.msk [vmem:[#allocation2 + $0xc0] sm:$0xff] %vm312_vm0, %v899_v27  ;;  %v884_v32 = vadd.f32 %v818_v28, %v354_v25 }
  0xf6   : > { %1134 = vst.msk [vmem:[%s1811_s15 + $0x58] sm:$0xf] %vm1111_vm1, %v1101_v29  ;;  %v1086_v33 = vpack.c.bf16 %v1054_v30, %v1054_v30  ;;  %v1002_v34 = vmul.f32 %v1796_v61, %v966_v31  ;;  %v951_v35 = vld [vmem:[#allocation2 + $0x40] sm:$0xff] }
  0xf7   : > { %v987_v36 = vmul.f32 %v1796_v61, %v951_v35  ;;  %917 = vst.msk [vmem:[#allocation2 + $0x48] sm:$0xff] %vm312_vm0, %v884_v32  ;;  %v768_v37 = vpop.f32.mrf.mxu2 }
  0xf8   : > { %1119 = vst.msk [vmem:[%s1811_s15 + $0x1c] sm:$0xf] %vm1111_vm1, %v1086_v33  ;;  %v1038_v38 = vadd.f32 %v1801_v0, %v1002_v34  ;;  %v857_v40 = vpop.f32.mrf.mxu3 }
  0xf9   : > { %v1023_v41 = vadd.f32 %v1801_v0, %v987_v36  ;;  %v858_v42 = vadd.f32 %v857_v40, %v768_v37  ;;  %v731_v43 = vpop.f32.mrf.mxu0  ;;  %v373_v37 = vld [vmem:[#allocation2 + $0xe0] sm:$0xff] }
  0xfa   : > { %v1070_v44 = vmax.f32 %v1038_v38, 0.0  ;;  %v820_v46 = vpop.f32.mrf.mxu1 }
  0xfb   : > { %v1055_v47 = vmax.f32 %v1023_v41, 0.0  ;;  %v900_v48 = vadd.f32 %v858_v42, %v370_v39  ;;  %v821_v49 = vadd.f32 %v820_v46, %v731_v43  ;;  %v358_v43 = vld [vmem:[#allocation2 + $0x68] sm:$0xff] }
  0xfc   : > { %v1102_v50 = vpack.c.bf16 %v1070_v44, %v1070_v44  ;;  %v967_v51 = vld [vmem:[#allocation2 + $0xc0] sm:$0xff] }
  0xfd   : > { %v1087_v52 = vpack.c.bf16 %v1055_v47, %v1055_v47  ;;  %v1003_v53 = vmul.f32 %v1796_v61, %v967_v51  ;;  %933 = vst.msk [vmem:[#allocation2 + $0xc8] sm:$0xff] %vm312_vm0, %v900_v48  ;;  %v885_v54 = vadd.f32 %v821_v49, %v355_v45 }
  0xfe   : > { %1135 = vst.msk [vmem:[%s1811_s15 + $0x5c] sm:$0xf] %vm1111_vm1, %v1102_v50  ;;  %v952_v55 = vld [vmem:[#allocation2 + $0x48] sm:$0xff] }
  0xff   : > { %1120 = vst.msk [vmem:[%s1811_s15 + $0x20] sm:$0xf] %vm1111_vm1, %v1087_v52  ;;  %v1039_v56 = vadd.f32 %v1801_v0, %v1003_v53  ;;  %v988_v57 = vmul.f32 %v1796_v61, %v952_v55  ;;  %v771_v58 = vpop.f32.mrf.mxu2 }
 0x100   : > { %918 = vst.msk [vmem:[#allocation2 + $0x50] sm:$0xff] %vm312_vm0, %v885_v54  ;;  %v860_v60 = vpop.f32.mrf.mxu3 }
 0x101   : > { %v1071_v62 = vmax.f32 %v1039_v56, 0.0  ;;  %v1024_v63 = vadd.f32 %v1801_v0, %v988_v57  ;;  %v861_v1 = vadd.f32 %v860_v60, %v771_v58  ;;  %v733_v2 = vpop.f32.mrf.mxu0  ;;  %v374_v57 = vld [vmem:[#allocation2 + $0xe8] sm:$0xff] }
 0x102   : > { %v822_v4 = vpop.f32.mrf.mxu1 }
 0x103   : > { %v1103_v5 = vpack.c.bf16 %v1071_v62, %v1071_v62  ;;  %v1056_v6 = vmax.f32 %v1024_v63, 0.0  ;;  %v901_v7 = vadd.f32 %v861_v1, %v371_v59  ;;  %v823_v8 = vadd.f32 %v822_v4, %v733_v2  ;;  %v359_v1 = vld [vmem:[#allocation2 + $0x70] sm:$0xff] }
 0x104   : > { %v968_v9 = vld [vmem:[#allocation2 + $0xc8] sm:$0xff] }
 0x105   : > { %1136 = vst.msk [vmem:[%s1811_s15 + $0x60] sm:$0xf] %vm1111_vm1, %v1103_v5  ;;  %v1088_v10 = vpack.c.bf16 %v1056_v6, %v1056_v6  ;;  %v1004_v11 = vmul.f32 %v1796_v61, %v968_v9  ;;  %v886_v12 = vadd.f32 %v823_v8, %v356_v3 }
 0x106   : > { %934 = vst.msk [vmem:[#allocation2 + $0xd0] sm:$0xff] %vm312_vm0, %v901_v7 }
 0x107   : > { %1121 = vst.msk [vmem:[%s1811_s15 + $0x24] sm:$0xf] %vm1111_vm1, %v1088_v10  ;;  %v1040_v13 = vadd.f32 %v1801_v0, %v1004_v11  ;;  %v953_v14 = vld [vmem:[#allocation2 + $0x50] sm:$0xff]  ;;  %v773_v15 = vpop.f32.mrf.mxu2 }
 0x108   : > { %v989_v16 = vmul.f32 %v1796_v61, %v953_v14  ;;  %919 = vst.msk [vmem:[#allocation2 + $0x58] sm:$0xff] %vm312_vm0, %v886_v12  ;;  %v862_v18 = vpop.f32.mrf.mxu3 }
 0x109   : > { %v1072_v19 = vmax.f32 %v1040_v13, 0.0  ;;  %v863_v20 = vadd.f32 %v862_v18, %v773_v15  ;;  %v736_v21 = vpop.f32.mrf.mxu0  ;;  %v375_v15 = vld [vmem:[#allocation2 + $0xf0] sm:$0xff] }
 0x10a   : > { %v1025_v22 = vadd.f32 %v1801_v0, %v989_v16  ;;  %v825_v24 = vpop.f32.mrf.mxu1 }
 0x10b   : > { %v1104_v25 = vpack.c.bf16 %v1072_v19, %v1072_v19  ;;  %v902_v26 = vadd.f32 %v863_v20, %v372_v17  ;;  %v826_v27 = vadd.f32 %v825_v24, %v736_v21  ;;  %v360_v21 = vld [vmem:[#allocation2 + $0x78] sm:$0xff] }
 0x10c   : > { %v1057_v28 = vmax.f32 %v1025_v22, 0.0 }
 0x10d   : > { %1137 = vst.msk [vmem:[%s1811_s15 + $0x64] sm:$0xf] %vm1111_vm1, %v1104_v25  ;;  %v969_v29 = vld [vmem:[#allocation2 + $0xd0] sm:$0xff]  ;;  %v887_v30 = vadd.f32 %v826_v27, %v357_v23 }
 0x10e   : > { %v1089_v31 = vpack.c.bf16 %v1057_v28, %v1057_v28  ;;  %v1005_v32 = vmul.f32 %v1796_v61, %v969_v29  ;;  %935 = vst.msk [vmem:[#allocation2 + $0xd8] sm:$0xff] %vm312_vm0, %v902_v26 }
 0x10f   : > { %v954_v33 = vld [vmem:[#allocation2 + $0x58] sm:$0xff]  ;;  %920 = vst.msk [vmem:[#allocation2 + $0x60] sm:$0xff] %vm312_vm0, %v887_v30  ;;  %v776_v34 = vpop.f32.mrf.mxu2 }
 0x110   : > { %1122 = vst.msk [vmem:[%s1811_s15 + $0x28] sm:$0xf] %vm1111_vm1, %v1089_v31  ;;  %v1041_v35 = vadd.f32 %v1801_v0, %v1005_v32  ;;  %v990_v36 = vmul.f32 %v1796_v61, %v954_v33  ;;  %v865_v38 = vpop.f32.mrf.mxu3 }
 0x111   : > { %v866_v39 = vadd.f32 %v865_v38, %v776_v34  ;;  %v738_v40 = vpop.f32.mrf.mxu0 }
 0x112   : > { %v1073_v41 = vmax.f32 %v1041_v35, 0.0  ;;  %v1026_v42 = vadd.f32 %v1801_v0, %v990_v36  ;;  %v827_v44 = vpop.f32.mrf.mxu1  ;;  %v376_v35 = vld [vmem:[#allocation2 + $0xf8] sm:$0xff] }
 0x113   : > { %v903_v45 = vadd.f32 %v866_v39, %v373_v37  ;;  %v828_v46 = vadd.f32 %v827_v44, %v738_v40 }
 0x114   : > { %v1105_v47 = vpack.c.bf16 %v1073_v41, %v1073_v41  ;;  %v1058_v48 = vmax.f32 %v1026_v42, 0.0 }
 0x115   : > { %v970_v49 = vld [vmem:[#allocation2 + $0xd8] sm:$0xff]  ;;  %936 = vst.msk [vmem:[#allocation2 + $0xe0] sm:$0xff] %vm312_vm0, %v903_v45  ;;  %v888_v50 = vadd.f32 %v828_v46, %v358_v43 }
 0x116   : > { %1138 = vst.msk [vmem:[%s1811_s15 + $0x68] sm:$0xf] %vm1111_vm1, %v1105_v47  ;;  %v1090_v51 = vpack.c.bf16 %v1058_v48, %v1058_v48  ;;  %v1006_v52 = vmul.f32 %v1796_v61, %v970_v49  ;;  %v955_v53 = vld [vmem:[#allocation2 + $0x60] sm:$0xff] }
 0x117   : > { %v991_v54 = vmul.f32 %v1796_v61, %v955_v53  ;;  %921 = vst.msk [vmem:[#allocation2 + $0x68] sm:$0xff] %vm312_vm0, %v888_v50  ;;  %v778_v55 = vpop.f32.mrf.mxu2 }
 0x118   : > { %1123 = vst.msk [vmem:[%s1811_s15 + $0x2c] sm:$0xf] %vm1111_vm1, %v1090_v51  ;;  %v1042_v56 = vadd.f32 %v1801_v0, %v1006_v52  ;;  %v867_v58 = vpop.f32.mrf.mxu3 }
 0x119   : > { %v1027_v59 = vadd.f32 %v1801_v0, %v991_v54  ;;  %v868_v60 = vadd.f32 %v867_v58, %v778_v55  ;;  %v741_v62 = vpop.f32.mrf.mxu0 }
 0x11a   : > { %v1074_v63 = vmax.f32 %v1042_v56, 0.0  ;;  %v830_v2 = vpop.f32.mrf.mxu1 }
 0x11b   : > { %v1059_v3 = vmax.f32 %v1027_v59, 0.0  ;;  %v904_v4 = vadd.f32 %v868_v60, %v374_v57  ;;  %v831_v5 = vadd.f32 %v830_v2, %v741_v62 }
 0x11c   : > { %v1106_v6 = vpack.c.bf16 %v1074_v63, %v1074_v63  ;;  %v971_v7 = vld [vmem:[#allocation2 + $0xe0] sm:$0xff] }
 0x11d   : > { %v1091_v8 = vpack.c.bf16 %v1059_v3, %v1059_v3  ;;  %v1007_v9 = vmul.f32 %v1796_v61, %v971_v7  ;;  %937 = vst.msk [vmem:[#allocation2 + $0xe8] sm:$0xff] %vm312_vm0, %v904_v4  ;;  %v889_v10 = vadd.f32 %v831_v5, %v359_v1 }
 0x11e   : > { %1139 = vst.msk [vmem:[%s1811_s15 + $0x6c] sm:$0xf] %vm1111_vm1, %v1106_v6  ;;  %v956_v11 = vld [vmem:[#allocation2 + $0x68] sm:$0xff] }
 0x11f   : > { %1124 = vst.msk [vmem:[%s1811_s15 + $0x30] sm:$0xf] %vm1111_vm1, %v1091_v8  ;;  %v1043_v12 = vadd.f32 %v1801_v0, %v1007_v9  ;;  %v992_v13 = vmul.f32 %v1796_v61, %v956_v11  ;;  %v781_v14 = vpop.f32.mrf.mxu2 }
 0x120   : > { %922 = vst.msk [vmem:[#allocation2 + $0x70] sm:$0xff] %vm312_vm0, %v889_v10  ;;  %v870_v16 = vpop.f32.mrf.mxu3 }
 0x121   : > { %v1075_v17 = vmax.f32 %v1043_v12, 0.0  ;;  %v1028_v18 = vadd.f32 %v1801_v0, %v992_v13  ;;  %v871_v19 = vadd.f32 %v870_v16, %v781_v14  ;;  %v743_v20 = vpop.f32.mrf.mxu0 }
 0x122   : > { %v832_v22 = vpop.f32.mrf.mxu1 }
 0x123   : > { %v1107_v23 = vpack.c.bf16 %v1075_v17, %v1075_v17  ;;  %v1060_v24 = vmax.f32 %v1028_v18, 0.0  ;;  %v905_v25 = vadd.f32 %v871_v19, %v375_v15  ;;  %v833_v26 = vadd.f32 %v832_v22, %v743_v20 }
 0x124   : > { %v972_v27 = vld [vmem:[#allocation2 + $0xe8] sm:$0xff] }
 0x125   : > { %1140 = vst.msk [vmem:[%s1811_s15 + $0x70] sm:$0xf] %vm1111_vm1, %v1107_v23  ;;  %v1092_v28 = vpack.c.bf16 %v1060_v24, %v1060_v24  ;;  %v1008_v29 = vmul.f32 %v1796_v61, %v972_v27  ;;  %v890_v30 = vadd.f32 %v833_v26, %v360_v21 }
 0x126   : > { %938 = vst.msk [vmem:[#allocation2 + $0xf0] sm:$0xff] %vm312_vm0, %v905_v25 }
 0x127   : > { %1125 = vst.msk [vmem:[%s1811_s15 + $0x34] sm:$0xf] %vm1111_vm1, %v1092_v28  ;;  %v1044_v31 = vadd.f32 %v1801_v0, %v1008_v29  ;;  %v957_v32 = vld [vmem:[#allocation2 + $0x70] sm:$0xff]  ;;  %v783_v33 = vpop.f32.mrf.mxu2 }
 0x128   : > { %v993_v34 = vmul.f32 %v1796_v61, %v957_v32  ;;  %923 = vst.msk [vmem:[#allocation2 + $0x78] sm:$0xff] %vm312_vm0, %v890_v30  ;;  %v872_v36 = vpop.f32.mrf.mxu3 }
 0x129   : > { %v1076_v37 = vmax.f32 %v1044_v31, 0.0  ;;  %v873_v38 = vadd.f32 %v872_v36, %v783_v33 }
 0x12a   : > { %v1029_v39 = vadd.f32 %v1801_v0, %v993_v34 }
 0x12b   : > { %v1108_v40 = vpack.c.bf16 %v1076_v37, %v1076_v37  ;;  %v906_v41 = vadd.f32 %v873_v38, %v376_v35 }
 0x12c   : > { %v1061_v42 = vmax.f32 %v1029_v39, 0.0 }
 0x12d   : > { %1141 = vst.msk [vmem:[%s1811_s15 + $0x74] sm:$0xf] %vm1111_vm1, %v1108_v40  ;;  %v973_v43 = vld [vmem:[#allocation2 + $0xf0] sm:$0xff] }
 0x12e   : > { %v1093_v44 = vpack.c.bf16 %v1061_v42, %v1061_v42  ;;  %v1009_v45 = vmul.f32 %v1796_v61, %v973_v43  ;;  %939 = vst.msk [vmem:[#allocation2 + $0xf8] sm:$0xff] %vm312_vm0, %v906_v41 }
 0x12f   : > { %v958_v46 = vld [vmem:[#allocation2 + $0x78] sm:$0xff] }
 0x130   : > { %1126 = vst.msk [vmem:[%s1811_s15 + $0x38] sm:$0xf] %vm1111_vm1, %v1093_v44  ;;  %v1045_v47 = vadd.f32 %v1801_v0, %v1009_v45  ;;  %v994_v48 = vmul.f32 %v1796_v61, %v958_v46 }
 0x132   : > { %v1077_v49 = vmax.f32 %v1045_v47, 0.0  ;;  %v1030_v50 = vadd.f32 %v1801_v0, %v994_v48 }
 0x134   : > { %v1109_v51 = vpack.c.bf16 %v1077_v49, %v1077_v49  ;;  %v1062_v52 = vmax.f32 %v1030_v50, 0.0 }
 0x135   : > { %v974_v53 = vld [vmem:[#allocation2 + $0xf8] sm:$0xff] }
 0x136   : > { %1142 = vst.msk [vmem:[%s1811_s15 + $0x78] sm:$0xf] %vm1111_vm1, %v1109_v51  ;;  %v1094_v54 = vpack.c.bf16 %v1062_v52, %v1062_v52  ;;  %v1010_v55 = vmul.f32 %v1796_v61, %v974_v53 }
 0x138   : > { %1127 = vst.msk [vmem:[%s1811_s15 + $0x3c] sm:$0xf] %vm1111_vm1, %v1094_v54  ;;  %v1046_v56 = vadd.f32 %v1801_v0, %v1010_v55 }
 0x13a   : > { %v1078_v57 = vmax.f32 %v1046_v56, 0.0 }
 0x13c   : > { %v1110_v58 = vpack.c.bf16 %v1078_v57, %v1078_v57 }
 0x13e   : > { %1143 = vst.msk [vmem:[%s1811_s15 + $0x7c] sm:$0xf] %vm1111_vm1, %v1110_v58 }
 0x13f PF: > { %s14_s17 = sadd.s32 1, %s1591_s17   ;;  %s1982_s15 = smov %s1587_s16 }
 0x140   : > { %p11_p5 = scmp.ge.s32.totalorder %s14_s17, 4   ;;  %s1983_s16 = smov %s1985_s18 }
 0x142   :  { %13 = sbr.rel (!%p11_p5) target bundleno = 2 (0x2), region = 83 }

</bundles_post_ra>
